<compile_context>
chip_gen: v5e
topology: v5e:2x2
jax: 0.10.0
libtpu: 0.0.40
codegen_flags: <defaults>
</compile_context>

<pallas_src>
import jax
import jax.numpy as jnp
from jax.experimental import pallas as pl
from jax.experimental.pallas import tpu as pltpu

HIDDEN = 64


def _round_up(x, m):
    return ((x + m - 1) // m) * m


def _qnetwork_kernel(x_ref, w1_ref, b1_ref, w2_ref, b2_ref, w3_ref, b3_ref,
                     o_ref):
    # x / weights are bf16; accumulation is f32 (preferred_element_type).
    x = x_ref[...]  # [tile_b, state_dim] bf16

    # fc1 + ReLU
    h1 = jnp.dot(x, w1_ref[...], preferred_element_type=jnp.float32)
    h1 = jnp.maximum(h1 + b1_ref[...], 0.0).astype(jnp.bfloat16)

    # fc2 + ReLU
    h2 = jnp.dot(h1, w2_ref[...], preferred_element_type=jnp.float32)
    h2 = jnp.maximum(h2 + b2_ref[...], 0.0).astype(jnp.bfloat16)

    # fc3 (no activation); output block is [tile_b, action_dim] f32
    out = jnp.dot(h2, w3_ref[...], preferred_element_type=jnp.float32)
    o_ref[...] = (out + b3_ref[...]).astype(o_ref.dtype)


def _choose_tiling(batch, tile_b_max):
    """Pick (tile_b, n_steps) with bounded padding waste.

    - tile is always a multiple of 8 (f32/bf16 sublane constraint on the
      x / output BlockSpecs), regardless of what the caller passed.
    - once the batch is >= 512 rows we force >= 2 grid steps so the
      "parallel" batch axis can shard across both v7x TensorCores.
    - padding waste is bounded to ~8 rows per grid step instead of a full
      tile; 256-row MXU-aligned tiles are used only when nearly free.
    """
    b8 = _round_up(max(int(batch), 1), 8)
    tile_b_max = _round_up(max(int(tile_b_max), 8), 8)
    min_steps = 2 if b8 >= 512 else 1
    n = max(min_steps, pl.cdiv(b8, tile_b_max))
    tile = _round_up(pl.cdiv(b8, n), 8)
    tile_mxu = _round_up(tile, 256)
    if tile_mxu * n - batch <= max(8 * n, batch // 32):
        tile = tile_mxu
    return tile, n


def qnetwork_forward(x, params, *, tile_b=2048):
    """Fused QNetwork forward pass.

    x:       [batch, state_dim] float (cast to bf16 for the matmuls)
    params:  dict from init_qnetwork_params
    returns: [batch, action_dim] float32
    """
    batch, state_dim = x.shape
    w1, b1 = params["w1"], params["b1"]
    w2, b2 = params["w2"], params["b2"]
    w3, b3 = params["w3"], params["b3"]
    action_dim = w3.shape[1]

    tile, n_steps = _choose_tiling(batch, tile_b)
    batch_padded = tile * n_steps

    x = x.astype(jnp.bfloat16)
    if batch_padded != batch:
        x = jnp.pad(x, ((0, batch_padded - batch), (0, 0)))

    # Weights/biases: full-array blocks with a constant block index -> they
    # stay resident in VMEM across every grid step.
    resident = lambda a: pl.BlockSpec(a.shape, lambda i: (0,) * a.ndim)

    flops = 2 * batch_padded * (state_dim * HIDDEN
                                + HIDDEN * HIDDEN
                                + HIDDEN * action_dim)
    weight_bytes = sum(int(a.size) * a.dtype.itemsize
                       for a in (w1, b1, w2, b2, w3, b3))
    bytes_accessed = (batch_padded * state_dim * 2      # x read (bf16)
                      + batch_padded * action_dim * 4   # out write (f32)
                      + weight_bytes)

    out = pl.pallas_call(
        _qnetwork_kernel,
        out_shape=jax.ShapeDtypeStruct((batch_padded, action_dim),
                                       jnp.float32),
        grid=(n_steps,),
        in_specs=[
            pl.BlockSpec((tile, state_dim), lambda i: (i, 0)),  # x: batched
            resident(w1), resident(b1),
            resident(w2), resident(b2),
            resident(w3), resident(b3),
        ],
        out_specs=pl.BlockSpec((tile, action_dim), lambda i: (i, 0)),
        compiler_params=pltpu.CompilerParams(
            dimension_semantics=("parallel",)),
        cost_estimate=pl.CostEstimate(flops=flops, transcendentals=0,
                                      bytes_accessed=bytes_accessed),
    )(x, w1, b1, w2, b2, w3, b3)

    # Strip batch padding (output width is already exactly action_dim).
    return out[:batch] if batch_padded != batch else out


def init_qnetwork_params(key, state_dim, action_dim, hidden=HIDDEN,
                         weight_dtype=jnp.bfloat16):
    """PyTorch-style init: U(-1/sqrt(fan_in), 1/sqrt(fan_in)).

    Weights are stored [in_dim, out_dim] in bf16 (f32 accumulation happens
    in-kernel); biases stay f32 and are added after the f32 accumulation.
    """
    def linear(k, in_dim, out_dim):
        kw, kb = jax.random.split(k)
        bound = 1.0 / jnp.sqrt(jnp.float32(in_dim))
        w = jax.random.uniform(kw, (in_dim, out_dim), jnp.float32,
                               minval=-bound, maxval=bound).astype(weight_dtype)
        b = jax.random.uniform(kb, (1, out_dim), jnp.float32,
                               minval=-bound, maxval=bound)
        return w, b

    k1, k2, k3 = jax.random.split(key, 3)
    w1, b1 = linear(k1, state_dim, hidden)
    w2, b2 = linear(k2, hidden, hidden)
    w3, b3 = linear(k3, hidden, action_dim)
    return {"w1": w1, "b1": b1, "w2": w2, "b2": b2, "w3": w3, "b3": b3}


def qnetwork_reference(x, params):
    """Pure-JAX reference mirroring the kernel's bf16-operand / f32-accum
    numerics (operands are bf16-representable, so the f32 dots are exact)."""
    f32 = jnp.float32
    xb = x.astype(jnp.bfloat16).astype(f32)
    w1 = params["w1"].astype(f32)
    w2 = params["w2"].astype(f32)
    w3 = params["w3"].astype(f32)
    h = jnp.maximum(xb @ w1 + params["b1"], 0.0)
    h = h.astype(jnp.bfloat16).astype(f32)
    h = jnp.maximum(h @ w2 + params["b2"], 0.0)
    h = h.astype(jnp.bfloat16).astype(f32)
    return h @ w3 + params["b3"]


if __name__ == "__main__":
    key = jax.random.PRNGKey(0)
    k_params, k_x1, k_x2, k_x3 = jax.random.split(key, 4)

    state_dim, action_dim = 16, 4
    params = init_qnetwork_params(k_params, state_dim, action_dim)

    # Case 1: tiny batch, single grid step, adaptive tile shrinks to 8 rows.
    batch1 = 8
    x1 = jax.random.normal(k_x1, (batch1, state_dim), dtype=jnp.float32)
    out1 = jax.block_until_ready(qnetwork_forward(x1, params))
    ref1 = qnetwork_reference(x1, params)
    assert out1.shape == (batch1, action_dim)
    assert jnp.allclose(out1, ref1, atol=1e-3, rtol=1e-3)

    # Case 2: batch not a multiple of 8, caller-supplied tiny tile ->
    # multi-step pipelined grid + batch padding path.
    batch2 = 10
    x2 = jax.random.normal(k_x2, (batch2, state_dim), dtype=jnp.float32)
    out2 = jax.block_until_ready(qnetwork_forward(x2, params, tile_b=8))
    ref2 = qnetwork_reference(x2, params)
    assert out2.shape == (batch2, action_dim)
    assert jnp.allclose(out2, ref2, atol=1e-3, rtol=1e-3)

    # Case 3: batch >= 512 with default tile -> wrapper forces >= 2 grid
    # steps (v7x dual-TC path) with minimal padding waste.
    batch3 = 520
    x3 = jax.random.normal(k_x3, (batch3, state_dim), dtype=jnp.float32)
    out3 = jax.block_until_ready(qnetwork_forward(x3, params))
    ref3 = qnetwork_reference(x3, params)
    assert out3.shape == (batch3, action_dim)
    assert jnp.allclose(out3, ref3, atol=1e-3, rtol=1e-3)

    print("KERNEL_OK")
</pallas_src>

<mosaic_0001>
module attributes {stable_mosaic.version = 11 : i64} {
  func.func @_qnetwork_kernel(%arg0: i32, %arg1: memref<8x16xbf16, #tpu.memory_space<vmem>>, %arg2: memref<16x64xbf16, #tpu.memory_space<vmem>>, %arg3: memref<1x64xf32, #tpu.memory_space<vmem>>, %arg4: memref<64x64xbf16, #tpu.memory_space<vmem>>, %arg5: memref<1x64xf32, #tpu.memory_space<vmem>>, %arg6: memref<64x4xbf16, #tpu.memory_space<vmem>>, %arg7: memref<1x4xf32, #tpu.memory_space<vmem>>, %arg8: memref<8x4xf32, #tpu.memory_space<vmem>>) attributes {dimension_semantics = [#tpu.dimension_semantics<parallel>], iteration_bounds = array<i64: 1>, scalar_prefetch = 0 : i64, scratch_operands = 0 : i64, tpu.core_type = #tpu.core_type<tc>, window_params = [{transform_indices = @transform_0, window_bounds = array<i64: 8, 16>}, {pipeline_mode = #tpu.pipeline_mode<synchronous>, transform_indices = @transform_1, window_bounds = array<i64: 16, 64>}, {pipeline_mode = #tpu.pipeline_mode<synchronous>, transform_indices = @transform_2, window_bounds = array<i64: 1, 64>}, {pipeline_mode = #tpu.pipeline_mode<synchronous>, transform_indices = @transform_3, window_bounds = array<i64: 64, 64>}, {pipeline_mode = #tpu.pipeline_mode<synchronous>, transform_indices = @transform_4, window_bounds = array<i64: 1, 64>}, {pipeline_mode = #tpu.pipeline_mode<synchronous>, transform_indices = @transform_5, window_bounds = array<i64: 64, 4>}, {pipeline_mode = #tpu.pipeline_mode<synchronous>, transform_indices = @transform_6, window_bounds = array<i64: 1, 4>}, {transform_indices = @transform_7, window_bounds = array<i64: 8, 4>}]} {
    %c0 = arith.constant 0 : index
    %c0_0 = arith.constant 0 : index
    %0 = vector.load %arg1[%c0, %c0_0] : memref<8x16xbf16, #tpu.memory_space<vmem>>, vector<8x16xbf16>
    %c0_1 = arith.constant 0 : index
    %c0_2 = arith.constant 0 : index
    %1 = vector.load %arg2[%c0_1, %c0_2] : memref<16x64xbf16, #tpu.memory_space<vmem>>, vector<16x64xbf16>
    %cst = arith.constant dense<0.000000e+00> : vector<8x64xf32>
    %2 = tpu.matmul %0, %1, %cst {dimension_numbers = #tpu.dot_dimension_numbers<[1], [0], [0], [1], [0, 0, 1, 1], [], []>} : vector<8x16xbf16>, vector<16x64xbf16>, vector<8x64xf32> -> vector<8x64xf32>
    %c0_3 = arith.constant 0 : index
    %c0_4 = arith.constant 0 : index
    %3 = vector.load %arg3[%c0_3, %c0_4] : memref<1x64xf32, #tpu.memory_space<vmem>>, vector<1x64xf32>
    %4 = vector.broadcast %3 : vector<1x64xf32> to vector<8x64xf32>
    %5 = arith.addf %2, %4 : vector<8x64xf32>
    %cst_5 = arith.constant 0.000000e+00 : f32
    %6 = vector.broadcast %cst_5 : f32 to vector<8x64xf32>
    %7 = arith.maximumf %5, %6 : vector<8x64xf32>
    %8 = arith.truncf %7 : vector<8x64xf32> to vector<8x64xbf16>
    %c0_6 = arith.constant 0 : index
    %c0_7 = arith.constant 0 : index
    %9 = vector.load %arg4[%c0_6, %c0_7] : memref<64x64xbf16, #tpu.memory_space<vmem>>, vector<64x64xbf16>
    %cst_8 = arith.constant dense<0.000000e+00> : vector<8x64xf32>
    %10 = tpu.matmul %8, %9, %cst_8 {dimension_numbers = #tpu.dot_dimension_numbers<[1], [0], [0], [1], [0, 0, 1, 1], [], []>} : vector<8x64xbf16>, vector<64x64xbf16>, vector<8x64xf32> -> vector<8x64xf32>
    %c0_9 = arith.constant 0 : index
    %c0_10 = arith.constant 0 : index
    %11 = vector.load %arg5[%c0_9, %c0_10] : memref<1x64xf32, #tpu.memory_space<vmem>>, vector<1x64xf32>
    %12 = vector.broadcast %11 : vector<1x64xf32> to vector<8x64xf32>
    %13 = arith.addf %10, %12 : vector<8x64xf32>
    %cst_11 = arith.constant 0.000000e+00 : f32
    %14 = vector.broadcast %cst_11 : f32 to vector<8x64xf32>
    %15 = arith.maximumf %13, %14 : vector<8x64xf32>
    %16 = arith.truncf %15 : vector<8x64xf32> to vector<8x64xbf16>
    %c0_12 = arith.constant 0 : index
    %c0_13 = arith.constant 0 : index
    %17 = vector.load %arg6[%c0_12, %c0_13] : memref<64x4xbf16, #tpu.memory_space<vmem>>, vector<64x4xbf16>
    %cst_14 = arith.constant dense<0.000000e+00> : vector<8x4xf32>
    %18 = tpu.matmul %16, %17, %cst_14 {dimension_numbers = #tpu.dot_dimension_numbers<[1], [0], [0], [1], [0, 0, 1, 1], [], []>} : vector<8x64xbf16>, vector<64x4xbf16>, vector<8x4xf32> -> vector<8x4xf32>
    %c0_15 = arith.constant 0 : index
    %c0_16 = arith.constant 0 : index
    %19 = vector.load %arg7[%c0_15, %c0_16] : memref<1x4xf32, #tpu.memory_space<vmem>>, vector<1x4xf32>
    %20 = vector.broadcast %19 : vector<1x4xf32> to vector<8x4xf32>
    %21 = arith.addf %18, %20 : vector<8x4xf32>
    %c0_17 = arith.constant 0 : index
    %c0_18 = arith.constant 0 : index
    %22 = vector.load %arg8[%c0_17, %c0_18] : memref<8x4xf32, #tpu.memory_space<vmem>>, vector<8x4xf32>
    tpu.vector_store %arg8[%c0_17, %c0_18], %21 {strides = array<i32>} : memref<8x4xf32, #tpu.memory_space<vmem>>, vector<8x4xf32>,
    return
  }
  func.func @transform_0(%arg0: i32) -> (i32, i32) {
    %c0_i32 = arith.constant 0 : i32
    %c0_i32_0 = arith.constant 0 : i32
    return %arg0, %c0_i32 : i32, i32
  }
  func.func @transform_1(%arg0: i32) -> (i32, i32) {
    %c0_i32 = arith.constant 0 : i32
    %c0_i32_0 = arith.constant 0 : i32
    %c0_i32_1 = arith.constant 0 : i32
    return %c0_i32, %c0_i32_0 : i32, i32
  }
  func.func @transform_2(%arg0: i32) -> (i32, i32) {
    %c0_i32 = arith.constant 0 : i32
    %c0_i32_0 = arith.constant 0 : i32
    %c0_i32_1 = arith.constant 0 : i32
    return %c0_i32, %c0_i32_0 : i32, i32
  }
  func.func @transform_3(%arg0: i32) -> (i32, i32) {
    %c0_i32 = arith.constant 0 : i32
    %c0_i32_0 = arith.constant 0 : i32
    %c0_i32_1 = arith.constant 0 : i32
    return %c0_i32, %c0_i32_0 : i32, i32
  }
  func.func @transform_4(%arg0: i32) -> (i32, i32) {
    %c0_i32 = arith.constant 0 : i32
    %c0_i32_0 = arith.constant 0 : i32
    %c0_i32_1 = arith.constant 0 : i32
    return %c0_i32, %c0_i32_0 : i32, i32
  }
  func.func @transform_5(%arg0: i32) -> (i32, i32) {
    %c0_i32 = arith.constant 0 : i32
    %c0_i32_0 = arith.constant 0 : i32
    %c0_i32_1 = arith.constant 0 : i32
    return %c0_i32, %c0_i32_0 : i32, i32
  }
  func.func @transform_6(%arg0: i32) -> (i32, i32) {
    %c0_i32 = arith.constant 0 : i32
    %c0_i32_0 = arith.constant 0 : i32
    %c0_i32_1 = arith.constant 0 : i32
    return %c0_i32, %c0_i32_0 : i32, i32
  }
  func.func @transform_7(%arg0: i32) -> (i32, i32) {
    %c0_i32 = arith.constant 0 : i32
    %c0_i32_0 = arith.constant 0 : i32
    return %arg0, %c0_i32 : i32, i32
  }
}

</mosaic_0001>

<bundles_post_ra>
// kernel: tpu_custom_call.1
= control target key start
LH: loop header
LB: loop body
LE: loop exit
PB: predicated region body
PF: predicated region fallthrough
CT: control target
= control target key end

     0   :  { %12 = vsyncpa [#allocation3], 0  ;;  %s436_s0 = inlined_call_operand.vmem [shape: bf16[8,16], index: 0, kind: input, shape index: {}]   ;;  %s437_s1 = inlined_call_operand.hbm [shape: bf16[16,64], index: 1, kind: input, shape index: {}]   ;;  %s438_s2 = inlined_call_operand.hbm [shape: f32[1,64], index: 2, kind: input, shape index: {}]   ;;  %s439_s3 = inlined_call_operand.vmem [shape: bf16[64,64], index: 3, kind: input, shape index: {}]   ;;  %s440_s4 = inlined_call_operand.hbm [shape: f32[1,64], index: 4, kind: input, shape index: {}]   ;;  %s441_s5 = inlined_call_operand.vmem [shape: bf16[64,4], index: 5, kind: input, shape index: {}]   ;;  %s442_s6 = inlined_call_operand.vmem [shape: f32[1,4], index: 6, kind: input, shape index: {}]   ;;  %s443_s7 = inlined_call_operand.vmem [shape: f32[8,4], index: 7, kind: output, shape index: {}]  }
   0x1   :  { %13 = vsyncpa [#allocation5], 0  ;;  %s34_s26 = sshll.u32 %s438_s2, 4  ;;  %s349_s27 = smov [#allocation4]   ;;  %s35_s26 = int_to_ptr.hbm [resolvable:$true] %s34_s26 }
   0x2   :  { %s36_s28 = sshll.u32 %s349_s27, 4  ;;  %s20_s8 = sshll.u32 %s437_s1, 4  ;;  %s37_s28 = int_to_ptr.vmem [resolvable:$true] %s36_s28  ;;  %s21_s8 = int_to_ptr.hbm [resolvable:$true] %s20_s8 }
   0x3   :  { %39 = dma.hbm_to_vmem [thread:$0]  %s35_s26, 16, %s37_s28, [#allocation5]  }
   0x4   :  { %s350_s9 = smov [#allocation2]   ;;  %s351_s11 = smov 64  }
   0x5   :  { %s22_s10 = sshll.u32 %s350_s9, 4  ;;  %s352_s12 = smov 4   ;;  %s23_s10 = int_to_ptr.vmem [resolvable:$true] %s22_s10 }
   0x6   :  { %28 = dma.hbm_to_vmem [thread:$0]  %s21_s8, 128, %s23_s10, [#allocation3], %s351_s11, %s351_s11, %s352_s12  }
   0x7   :  { %s47_s2 = sshll.u32 %s440_s4, 4  ;;  %s353_s15 = smov [#allocation6]   ;;  %s48_s2 = int_to_ptr.hbm [resolvable:$true] %s47_s2 }
   0x8   :  { %s49_s16 = sshll.u32 %s353_s15, 4  ;;  %s50_s16 = int_to_ptr.vmem [resolvable:$true] %s49_s16 }
   0x9   :  { %52 = dma.hbm_to_vmem [thread:$0]  %s48_s2, 16, %s50_s16, [#allocation5]  }
   0xa   :  { %345 = dma.done.wait [#allocation3], 128  }
   0xb   :  { %346 = vsyncadd [#allocation3], 4294967168 }
   0xc   :  { %347 = dma.done.wait [#allocation5], 32  }
   0xd   :  { %348 = vsyncadd [#allocation5], 4294967264  ;;  %v256_v0 = vld [vmem:[#allocation2] sm:$0xff]  ;;  %v260_v1 = vld [vmem:[%s439_s3 + $0x18] sm:$0xff]  ;;  %vm83_vm0 = vcmask 130048   ;;  %vm138_vm1 = vcmask 523264  }
   0xe   :  { %v70_v2 = vld [vmem:[%s436_s0] sm:$0xf]  ;;  %94 = vmatpush.bf16.msra.mxu0 %v256_v0  ;;  %146 = vmatpush.bf16.msra.mxu1 %v260_v1  ;;  %v259_v3 = vld [vmem:[%s439_s3 + $0x10] sm:$0xff]  ;;  %v258_v4 = vld [vmem:[%s439_s3 + $0x8] sm:$0xff]  ;;  %vm209_vm2 = vcmask 31744  }
   0xf   :  { %v257_v5 = vld [vmem:[%s439_s3] sm:$0xff]  ;;  %v264_v6 = vld [vmem:[%s441_s5 + $0x18] sm:$0xff]  ;;  %v263_v7 = vld [vmem:[%s441_s5 + $0x10] sm:$0xff] }
  0x10   :  { %200 = vmatpush.bf16.msra.mxu2 %v264_v6  ;;  %v270_v8 = vld [vmem:[#allocation4] ss:$0 sm:$0xff]  ;;  %v261_v15 = vld [vmem:[%s441_s5] sm:$0xff]  ;;  %v271_v16 = vld [vmem:[#allocation6] ss:$0 sm:$0xff] }
  0x11   :  { %221 = vmatmul.msk.bf16.vlgmr.msra.gmra.mxu0 %vm83_vm0, %v70_v2  ;;  %v262_v14 = vld [vmem:[%s441_s5 + $0x8] sm:$0xff]  ;;  %v272_v22 = vld [vmem:[%s442_s6] ss:$0 sm:$0xff] }
  0x12   :  { %147 = vmatpush.bf16.msra.mxu1 %v259_v3 }
  0x14   :  { %201 = vmatpush.bf16.msra.mxu2 %v263_v7 }
  0x16   :  { %148 = vmatpush.bf16.msra.mxu1 %v258_v4 }
  0x18   :  { %202 = vmatpush.bf16.msra.mxu2 %v262_v14 }
  0x1a   :  { %149 = vmatpush.bf16.msra.mxu1 %v257_v5 }
  0x1c   :  { %203 = vmatpush.bf16.msra.mxu2 %v261_v15 }
  0x8e   :  { %v96_v9 = vpop.f32.mrf.mxu0 }
  0x8f   :  { %v97_v10 = vadd.f32 %v270_v8, %v96_v9 }
  0x91   :  { %v100_v11 = vmax.f32 %v97_v10, 0.0 }
  0x93   :  { %v101_v12 = vpack.c.bf16 %v100_v11, %v100_v11 }
  0x95   :  { %238 = vmatmul.msk.bf16.vlgmr.msra.gmra.mxu1 %vm138_vm1, %v101_v12 }
  0x96   :  { %v98_v13 = vpop.f32.mrf.mxu0 }
 0x112   :  { %v151_v17 = vpop.f32.mrf.mxu1 }
 0x113   :  { %v152_v18 = vadd.f32 %v271_v16, %v151_v17 }
 0x115   :  { %v155_v19 = vmax.f32 %v152_v18, 0.0 }
 0x117   :  { %v156_v20 = vpack.c.bf16 %v155_v19, %v155_v19 }
 0x119   :  { %255 = vmatmul.msk.bf16.vlgmr.msra.gmra.mxu2 %vm138_vm1, %v156_v20 }
 0x11a   :  { %v153_v21 = vpop.f32.mrf.mxu1 }
 0x19c   :  { %v205_v23 = vpop.f32.mrf.mxu2 }
 0x19d   :  { %v206_v24 = vadd.f32 %v272_v22, %v205_v23 }
 0x19f   :  { %210 = vst.msk [vmem:[%s443_s7] sm:$0xff] %vm209_vm2, %v206_v24 }
 0x1a4   :  { %v207_v25 = vpop.f32.mrf.mxu2 }
 0x1a5   :  { %215 = vsyncpa [#allocation3], 1 }
 0x1a6   :  { %216 = vsyncpa [#allocation5], 1 }

</bundles_post_ra>
